<compile_context>
chip_gen: v7x
topology: tpu7x:2x2x1
jax: 0.10.0
libtpu: 0.0.40
codegen_flags: <defaults>
</compile_context>

<pallas_src>
import jax
import jax.numpy as jnp
from jax.experimental import pallas as pl
from jax.experimental.pallas import tpu as pltpu


def _round_up(x: int, m: int) -> int:
    return ((x + m - 1) // m) * m


def denoise_kernel(x_ref, w_ref, b_ref, o_ref):
    # x_ref: (TM, Nf)  activation tile (lane-dense after the fold)
    # w_ref: (Nf, Nf)  pre-transposed (block-diagonal) weight, VMEM-resident
    # b_ref: (1,  Nf)  tiled bias, VMEM-resident
    # o_ref: (TM, Nf)  output tile (lane-dense stores)
    acc = jnp.dot(x_ref[...], w_ref[...], preferred_element_type=jnp.float32)
    acc = acc + b_ref[...].astype(jnp.float32)
    o_ref[...] = jnp.maximum(acc, 0.0).astype(o_ref.dtype)


def denoise_block(x, weight, bias, *, force_pallas: bool = False):
    """Equivalent of: relu(x @ weight.T + bias), for x of shape (..., nunits).

    weight: (nunits_out, nunits_in) in PyTorch nn.Linear layout (square here).
    """
    nunits = weight.shape[0]
    orig_shape = x.shape
    x2d = x.reshape(-1, nunits)                 # (M, nunits), row-major
    m = x2d.shape[0]
    itemsize = jnp.dtype(x.dtype).itemsize

    # Dispatch on bytes actually moved: below a couple of MiB the fused XLA
    # path wins over any kernel launch / pipeline setup cost.
    if not force_pallas and m * nunits * itemsize < (2 << 20):
        return jnp.maximum(x2d @ weight.T + bias, 0.0).reshape(orig_shape)

    # ---- Lane fold: pack `fold` consecutive logical rows into 128 lanes -----
    fold = 128 // nunits if (nunits < 128 and 128 % nunits == 0) else 1
    nf = fold * nunits                          # folded feature width (=128 when folded)

    wt = weight.T.astype(x.dtype)               # one-time transpose -> clean (K, N) RHS
    if fold > 1:
        # Block-diagonal with `fold` copies of W.T: folded_x @ w_big == rowwise x @ W.T.
        w_big = jnp.kron(jnp.eye(fold, dtype=wt.dtype), wt)        # (nf, nf)
        b_big = jnp.tile(bias, (fold,)).reshape(1, nf)             # (1, nf)
    else:
        w_big = wt
        b_big = bias.reshape(1, nf)

    m_ceil = _round_up(m, fold)                 # rows must group evenly into lane folds
    if m_ceil != m:
        x2d = jnp.pad(x2d, ((0, m_ceil - m), (0, 0)))
    m_fold = m_ceil // fold
    x_fold = x2d.reshape(m_fold, nf)            # pure row-major reinterpretation

    # ---- Tile the (folded) M axis -------------------------------------------
    sub = 8 * max(1, 4 // itemsize)             # sublane packing: 8 f32, 16 bf16, 32 i8
    tile_bytes = 4 << 20                        # ~4 MiB of input per grid step
    tm_target = max(sub, _round_up(tile_bytes // (nf * itemsize), sub))
    m_fold_sub = _round_up(m_fold, sub)

    num_steps = max(1, pl.cdiv(m_fold_sub, tm_target))
    # v7x has 2 TensorCores: keep >=2 grid steps when there is enough work.
    if num_steps == 1 and m_fold_sub >= 2 * 1024:
        num_steps = 2
    tm = _round_up(pl.cdiv(m_fold_sub, num_steps), sub)   # balanced, <= tm_target
    m_fold_pad = _round_up(m_fold_sub, tm)
    if m_fold_pad != m_fold:
        x_fold = jnp.pad(x_fold, ((0, m_fold_pad - m_fold), (0, 0)))
    grid = (m_fold_pad // tm,)

    # ---- VMEM: 2x double-buffered (in + out) tiles + resident weight/bias ----
    vmem_need = (2 * 2 * tm * nf + nf * nf + nf) * itemsize
    vmem_limit = min(vmem_need + vmem_need // 4 + (1 << 20), 64 << 20)  # v7x physical cap

    cost = pl.CostEstimate(
        flops=2 * m_fold_pad * nf * nf,
        transcendentals=0,
        bytes_accessed=(2 * m_fold_pad * nf + nf * nf + nf) * itemsize,
    )

    out = pl.pallas_call(
        denoise_kernel,
        out_shape=jax.ShapeDtypeStruct((m_fold_pad, nf), x.dtype),
        grid=grid,
        in_specs=[
            pl.BlockSpec((tm, nf), lambda i: (i, 0)),     # x tile, pipelined
            pl.BlockSpec((nf, nf), lambda i: (0, 0)),     # weight, VMEM-resident
            pl.BlockSpec((1, nf), lambda i: (0, 0)),      # bias, VMEM-resident
        ],
        out_specs=pl.BlockSpec((tm, nf), lambda i: (i, 0)),  # lane-dense stores
        compiler_params=pltpu.CompilerParams(
            dimension_semantics=("parallel",),            # megacore sharding on v7x
            vmem_limit_bytes=int(vmem_limit),
        ),
        cost_estimate=cost,
    )(x_fold, w_big, b_big)

    # Un-fold, drop padding rows, restore the original leading shape.
    out2d = out.reshape(m_fold_pad * fold, nunits)[:m]
    return out2d.reshape(orig_shape)


if __name__ == "__main__":
    nunits = 32
    batch, seq = 2, 8

    key = jax.random.PRNGKey(0)
    kx, kw, kb = jax.random.split(key, 3)

    # Deterministic parameter init mimicking nn.Linear's U(-1/sqrt(n), 1/sqrt(n)).
    bound = 1.0 / jnp.sqrt(jnp.float32(nunits))
    weight = jax.random.uniform(kw, (nunits, nunits), jnp.float32, -bound, bound)
    bias = jax.random.uniform(kb, (nunits,), jnp.float32, -bound, bound)

    x = jax.random.normal(kx, (batch, seq, nunits), jnp.float32)

    # Force the Pallas path so the kernel itself is exercised at demo shapes.
    out = denoise_block(x, weight, bias, force_pallas=True)
    out = jax.block_until_ready(out)

    # Reference check in plain JAX.
    ref = jnp.maximum(x @ weight.T + bias, 0.0)
    assert out.shape == x.shape
    assert jnp.allclose(out, ref, atol=1e-5, rtol=1e-5)

    print("KERNEL_OK")
</pallas_src>

<mosaic_0001>
module attributes {stable_mosaic.version = 11 : i64} {
  func.func @denoise_kernel(%arg0: i32, %arg1: memref<8x128xf32, #tpu.memory_space<vmem>>, %arg2: memref<128x128xf32, #tpu.memory_space<vmem>>, %arg3: memref<1x128xf32, #tpu.memory_space<vmem>>, %arg4: memref<8x128xf32, #tpu.memory_space<vmem>>) attributes {dimension_semantics = [#tpu.dimension_semantics<parallel>], iteration_bounds = array<i64: 1>, scalar_prefetch = 0 : i64, scratch_operands = 0 : i64, tpu.core_type = #tpu.core_type<tc>, window_params = [{transform_indices = @transform_0, window_bounds = array<i64: 8, 128>}, {pipeline_mode = #tpu.pipeline_mode<synchronous>, transform_indices = @transform_1, window_bounds = array<i64: 128, 128>}, {pipeline_mode = #tpu.pipeline_mode<synchronous>, transform_indices = @transform_2, window_bounds = array<i64: 1, 128>}, {transform_indices = @transform_3, window_bounds = array<i64: 8, 128>}]} {
    %c0 = arith.constant 0 : index
    %c0_0 = arith.constant 0 : index
    %0 = vector.load %arg1[%c0, %c0_0] : memref<8x128xf32, #tpu.memory_space<vmem>>, vector<8x128xf32>
    %c0_1 = arith.constant 0 : index
    %c0_2 = arith.constant 0 : index
    %1 = vector.load %arg2[%c0_1, %c0_2] : memref<128x128xf32, #tpu.memory_space<vmem>>, vector<128x128xf32>
    %cst = arith.constant dense<0.000000e+00> : vector<8x128xf32>
    %2 = tpu.matmul %0, %1, %cst {dimension_numbers = #tpu.dot_dimension_numbers<[1], [0], [0], [1], [0, 0, 1, 1], [], []>} : vector<8x128xf32>, vector<128x128xf32>, vector<8x128xf32> -> vector<8x128xf32>
    %c0_3 = arith.constant 0 : index
    %c0_4 = arith.constant 0 : index
    %3 = vector.load %arg3[%c0_3, %c0_4] : memref<1x128xf32, #tpu.memory_space<vmem>>, vector<1x128xf32>
    %4 = vector.broadcast %3 : vector<1x128xf32> to vector<8x128xf32>
    %5 = arith.addf %2, %4 : vector<8x128xf32>
    %cst_5 = arith.constant 0.000000e+00 : f32
    %6 = vector.broadcast %cst_5 : f32 to vector<8x128xf32>
    %7 = arith.maximumf %5, %6 : vector<8x128xf32>
    %c0_6 = arith.constant 0 : index
    %c0_7 = arith.constant 0 : index
    %8 = vector.load %arg4[%c0_6, %c0_7] : memref<8x128xf32, #tpu.memory_space<vmem>>, vector<8x128xf32>
    tpu.vector_store %arg4[%c0_6, %c0_7], %7 {strides = array<i32>} : memref<8x128xf32, #tpu.memory_space<vmem>>, vector<8x128xf32>,
    return
  }
  func.func @transform_0(%arg0: i32) -> (i32, i32) {
    %c0_i32 = arith.constant 0 : i32
    %c0_i32_0 = arith.constant 0 : i32
    return %arg0, %c0_i32 : i32, i32
  }
  func.func @transform_1(%arg0: i32) -> (i32, i32) {
    %c0_i32 = arith.constant 0 : i32
    %c0_i32_0 = arith.constant 0 : i32
    %c0_i32_1 = arith.constant 0 : i32
    return %c0_i32, %c0_i32_0 : i32, i32
  }
  func.func @transform_2(%arg0: i32) -> (i32, i32) {
    %c0_i32 = arith.constant 0 : i32
    %c0_i32_0 = arith.constant 0 : i32
    %c0_i32_1 = arith.constant 0 : i32
    return %c0_i32, %c0_i32_0 : i32, i32
  }
  func.func @transform_3(%arg0: i32) -> (i32, i32) {
    %c0_i32 = arith.constant 0 : i32
    %c0_i32_0 = arith.constant 0 : i32
    return %arg0, %c0_i32 : i32, i32
  }
}

</mosaic_0001>

<bundles_post_ra>
// kernel: tpu_custom_call.1
= control target key start
LH: loop header
LB: loop body
LE: loop exit
PB: predicated region body
PF: predicated region fallthrough
CT: control target
= control target key end

     0   :  { %8 = vsyncpa [#allocation3], 0  ;;  %s384_s0 = inlined_call_operand.hbm [shape: f32[8,128], index: 0, kind: input, shape index: {}]   ;;  %s385_s1 = inlined_call_operand.hbm [shape: f32[128,128], index: 1, kind: input, shape index: {}]   ;;  %s386_s2 = inlined_call_operand.vmem [shape: f32[1,128], index: 2, kind: input, shape index: {}]   ;;  %s387_s3 = inlined_call_operand.hbm [shape: f32[8,128], index: 3, kind: output, shape index: {}]  }
   0x1   :  { %9 = vsyncpa [#allocation6], 0 }
   0x2   :  { %10 = vsyncpa [#allocation4], 0  ;;  %s310_s12 = smov [#allocation2]   ;;  %s311_s14 = smov [#allocation5]  }
   0x3   :  { %s17_s13 = sshll.u32 %s310_s12, 4  ;;  %s26_s15 = sshll.u32 %s311_s14, 4  ;;  %s18_s13 = int_to_ptr.vmem [resolvable:$true] %s17_s13  ;;  %s338_s15 = int_to_ptr.vmem [resolvable:$true] %s26_s15 }
   0x4   :  { %s238_s18 = scalar_lea.hbm %s384_s0, 128 }
   0x5   :  { %p239_p0 = scmp.ne.s32.totalorder %s384_s0, %s238_s18  ;;  %p242_p1 = scmp.lt.u32.totalorder %s238_s18, %s384_s0 }
   0x7   :  { %p244_p2 = pnand %p242_p1, %p239_p0 }
   0x9   :  { %247 = shalt.err (!%p244_p2)
}
   0xa   :  { %s248_s23 = scalar_lea.vmem %s18_s13, 128  ;;  %p253_p4 = scmp.lt.s32.totalorder %s18_s13, %s18_s13 }
   0xb   :  { %p249_p3 = scmp.ne.s32.totalorder %s18_s13, %s248_s23  ;;  %p254_p5 = scmp.lt.s32.totalorder %s248_s23, %s248_s23 }
   0xd   :  { %p255_p6 = por %p254_p5, %p253_p4 }
   0xf   :  { %p256_p7 = pnand %p255_p6, %p249_p3 }
  0x11   :  { %259 = shalt.err (!%p256_p7)
}
  0x12   :  { %20 = dma.hbm_to_vmem [thread:$0]  %s384_s0, 128, %s18_s13, [#allocation3]  }
  0x13   :  { %s260_s28 = scalar_lea.hbm %s385_s1, 2048 }
  0x14   :  { %p261_p8 = scmp.ne.s32.totalorder %s385_s1, %s260_s28  ;;  %p264_p9 = scmp.lt.u32.totalorder %s260_s28, %s385_s1 }
  0x16   :  { %p266_p10 = pnand %p264_p9, %p261_p8 }
  0x18   :  { %269 = shalt.err (!%p266_p10)
}
  0x19   :  { %s270_s6 = scalar_lea.vmem %s338_s15, 2048  ;;  %p275_p12 = scmp.lt.s32.totalorder %s338_s15, %s338_s15 }
  0x1a   :  { %p271_p11 = scmp.ne.s32.totalorder %s338_s15, %s270_s6  ;;  %p276_p13 = scmp.lt.s32.totalorder %s270_s6, %s270_s6 }
  0x1c   :  { %p277_p0 = por %p276_p13, %p275_p12 }
  0x1e   :  { %p278_p1 = pnand %p277_p0, %p271_p11 }
  0x20   :  { %281 = shalt.err (!%p278_p1)
}
  0x21   :  { %s312_s0 = smov 128   ;;  %s313_s7 = smov 8  }
  0x22   :  { %32 = dma.hbm_to_vmem [thread:$0]  %s385_s1, 2048, %s338_s15, [#allocation6], %s312_s0, %s312_s0, %s313_s7  }
  0x23   :  { %304 = dma.done.wait [#allocation3], 128  }
  0x24   :  { %305 = vsyncadd [#allocation3], 4294967168 }
  0x25   :  { %306 = dma.done.wait [#allocation6], 2048  }
  0x26   :  { %307 = vsyncadd [#allocation6], 4294965248  ;;  %v314_v0 = vmov 0.0|0.0   ;;  %vm315_vm0 = vmmov 0   ;;  %v316_v1 = vmov 0.0   ;;  %v42_v2 = vld [vmem:[#allocation5] sm:$0xff] }
  0x27   :  { %206 = vmatprep.subr.bf16.mxu0 %v314_v0  ;;  %203 = vmatprep.mubr.msk.f32.mxu0 %vm315_vm0, %v316_v1  ;;  %v43_v3 = vld [vmem:[#allocation5 + $0x8] sm:$0xff]  ;;  %v44_v4 = vld [vmem:[#allocation5 + $0x10] sm:$0xff]  ;;  %v45_v6 = vld [vmem:[#allocation5 + $0x18] sm:$0xff]  ;;  %s317_s11 = smov [#allocation7]  }
  0x28   :  { %v207_v5 = vpack.c.bf16 %v43_v3, %v42_v2  ;;  %v210_v7 = vpack.c.bf16 %v45_v6, %v44_v4  ;;  %v46_v8 = vld [vmem:[#allocation5 + $0x20] sm:$0xff]  ;;  %v47_v9 = vld [vmem:[#allocation5 + $0x28] sm:$0xff]  ;;  %v48_v11 = vld [vmem:[#allocation5 + $0x30] sm:$0xff]  ;;  %s143_s12 = sshll.u32 %s317_s11, 4  ;;  %s144_s12 = int_to_ptr.vmem [resolvable:$true] %s143_s12 }
  0x29   :  { %v213_v10 = vpack.c.bf16 %v47_v9, %v46_v8  ;;  %v49_v12 = vld [vmem:[#allocation5 + $0x38] sm:$0xff]  ;;  %v50_v14 = vld [vmem:[#allocation5 + $0x40] sm:$0xff]  ;;  %v51_v15 = vld [vmem:[#allocation5 + $0x48] sm:$0xff]  ;;  %s282_s13 = scalar_lea.vmem %s144_s12, 128  ;;  %p287_p3 = scmp.lt.s32.totalorder %s144_s12, %s144_s12 }
  0x2a   :  { %208 = vmatpush3.bf16.msra.mxu0 %v207_v5  ;;  %v216_v13 = vpack.c.bf16 %v49_v12, %v48_v11  ;;  %v219_v16 = vpack.c.bf16 %v51_v15, %v50_v14  ;;  %v52_v17 = vld [vmem:[#allocation5 + $0x50] sm:$0xff]  ;;  %v53_v18 = vld [vmem:[#allocation5 + $0x58] sm:$0xff]  ;;  %v54_v20 = vld [vmem:[#allocation5 + $0x60] sm:$0xff]  ;;  %p283_p2 = scmp.ne.s32.totalorder %s144_s12, %s282_s13  ;;  %p288_p4 = scmp.lt.s32.totalorder %s282_s13, %s282_s13 }
  0x2b   :  { %209 = vmatprep.subr.bf16.mxu0 %v314_v0  ;;  %v222_v19 = vpack.c.bf16 %v53_v18, %v52_v17  ;;  %v55_v21 = vld [vmem:[#allocation5 + $0x68] sm:$0xff]  ;;  %v56_v23 = vld [vmem:[#allocation5 + $0x70] sm:$0xff]  ;;  %v57_v24 = vld [vmem:[#allocation5 + $0x78] sm:$0xff] }
  0x2c   :  { %v225_v22 = vpack.c.bf16 %v55_v21, %v54_v20  ;;  %v228_v25 = vpack.c.bf16 %v57_v24, %v56_v23  ;;  %v41_v26 = vld [vmem:[#allocation2] sm:$0xff]  ;;  %p289_p5 = por %p288_p4, %p287_p3 }
  0x2d   :  { %v153_v27 = vld [vmem:[%s386_s2] ss:$0 sm:$0xff] }
  0x2e   :  { %211 = vmatpush3.bf16.msra.mxu0 %v210_v7  ;;  %p290_p6 = pnand %p289_p5, %p283_p2 }
  0x2f   :  { %212 = vmatprep.subr.bf16.mxu0 %v314_v0 }
  0x32   :  { %214 = vmatpush3.bf16.msra.mxu0 %v213_v10 }
  0x33   :  { %215 = vmatprep.subr.bf16.mxu0 %v314_v0 }
  0x36   :  { %217 = vmatpush3.bf16.msra.mxu0 %v216_v13 }
  0x37   :  { %218 = vmatprep.subr.bf16.mxu0 %v314_v0 }
  0x3a   :  { %220 = vmatpush3.bf16.msra.mxu0 %v219_v16 }
  0x3b   :  { %221 = vmatprep.subr.bf16.mxu0 %v314_v0 }
  0x3e   :  { %223 = vmatpush3.bf16.msra.mxu0 %v222_v19 }
  0x3f   :  { %224 = vmatprep.subr.bf16.mxu0 %v314_v0 }
  0x42   :  { %226 = vmatpush3.bf16.msra.mxu0 %v225_v22 }
  0x43   :  { %227 = vmatprep.subr.bf16.mxu0 %v314_v0 }
  0x46   :  { %229 = vmatpush3.bf16.msra.mxu0 %v228_v25 }
  0x49   :  { %204 = vmatmul.mubr.f32.vlgmr.msra.gmra.mrb[0].mxu0 %v41_v26 }
 0x11c   :  { %v131_v28 = vpop.f32.mrb[0].mxu0 }
 0x11d   :  { %v132_v29 = vadd.f32 %v153_v27, %v131_v28  ;;  %v205_v30 = vpop.f32.mrb[1].mxu0 }
 0x11f   :  { %v135_v31 = vmax.f32 %v132_v29, 0.0 }
 0x121   :  { %136 = vst [vmem:[#allocation7] sm:$0xff] %v135_v31 }
 0x122   :  { %293 = shalt.err (!%p290_p6)
}
 0x123   :  { %s294_s16 = scalar_lea.hbm %s387_s3, 128 }
 0x124   :  { %p295_p7 = scmp.ne.s32.totalorder %s387_s3, %s294_s16  ;;  %p298_p8 = scmp.lt.u32.totalorder %s294_s16, %s387_s3 }
 0x126   :  { %p300_p9 = pnand %p298_p8, %p295_p7 }
 0x128   :  { %303 = shalt.err (!%p300_p9)
}
 0x129   :  { %146 = dma.vmem_to_hbm [thread:$0]  %s144_s12, 128, %s387_s3, [#allocation4]  }
 0x12a   :  { %308 = dma.done.wait [#allocation4], 128  }
 0x12b   :  { %309 = vsyncadd [#allocation4], 4294967168 }
 0x12c   :  { %150 = vsyncpa [#allocation3], 1 }
 0x12d   :  { %151 = vsyncpa [#allocation6], 1 }
 0x12e   :  { %152 = vsyncpa [#allocation4], 1 }

</bundles_post_ra>
